<compile_context>
chip_gen: v7x
topology: tpu7x:2x2x1
jax: 0.10.0
libtpu: 0.0.40
codegen_flags: <defaults>
</compile_context>

<pallas_src>
import jax
import jax.numpy as jnp
from jax.experimental import pallas as pl
from jax.experimental.pallas import tpu as pltpu


# ---------------------------------------------------------------------------
# Interpolation matrices (align_corners=True, matches torch.nn.Upsample)
# ---------------------------------------------------------------------------
def _interp_matrix(out_size: int, in_size: int) -> jnp.ndarray:
    """Row-stochastic (out_size, in_size) matrix for 1-D linear interpolation
    with align_corners=True semantics."""
    if in_size == 1:
        return jnp.ones((out_size, 1), dtype=jnp.float32)
    src = jnp.arange(out_size, dtype=jnp.float32) * (in_size - 1) / (out_size - 1)
    i0 = jnp.clip(jnp.floor(src).astype(jnp.int32), 0, in_size - 2)
    frac = src - i0.astype(jnp.float32)
    rows = jnp.arange(out_size)
    m = jnp.zeros((out_size, in_size), dtype=jnp.float32)
    m = m.at[rows, i0].add(1.0 - frac)
    m = m.at[rows, i0 + 1].add(frac)
    return m


# ---------------------------------------------------------------------------
# Kernels
# ---------------------------------------------------------------------------
def _upblock_kron_kernel(x_ref, w_ref, b_ref, kt_ref, o_ref):
    # x_ref : (1, C1, HW)    lane-dense input, resident across the C2-tile axis
    # w_ref : (tC2, C1)      1x1-conv weight tile (I/O dtype)
    # b_ref : (tC2, 1)       bias column (f32)
    # kt_ref: (HW, OHW)      (Ry ⊗ Rx)^T, f32, resident (constant index_map)
    # o_ref : (1, tC2, OHW)  lane-dense output tile
    y = jnp.dot(w_ref[...], x_ref[0], preferred_element_type=jnp.float32)
    y = y + b_ref[...]                                          # (tC2, HW)
    out = jnp.dot(y, kt_ref[...], preferred_element_type=jnp.float32)
    o_ref[0] = out.astype(o_ref.dtype)                          # (tC2, OHW)


def _upblock_sep_kernel(x_ref, w_ref, b_ref, ry_ref, rxt_ref, o_ref):
    # Height-first separable path (large spatial maps): one transpose before
    # the Ry matmul, free reshape into the RxT matmul, one final rearrange.
    oh, h = ry_ref.shape
    w_in, ow = rxt_ref.shape
    tc2 = w_ref.shape[0]

    y = jnp.dot(w_ref[...], x_ref[0], preferred_element_type=jnp.float32)
    y = y + b_ref[...]                                          # (tC2, H*W)

    # (tC2, H, W) -> (H, tC2*W): the only pre-matmul relayout.
    yt = y.reshape(tc2, h, w_in).transpose(1, 0, 2).reshape(h, tc2 * w_in)
    t = jnp.dot(ry_ref[...], yt, preferred_element_type=jnp.float32)   # (OH, tC2*W)
    u = jnp.dot(t.reshape(oh * tc2, w_in), rxt_ref[...],
                preferred_element_type=jnp.float32)                    # (OH*tC2, OW)
    out = u.reshape(oh, tc2, ow).transpose(1, 0, 2).reshape(tc2, oh * ow)
    o_ref[0] = out.astype(o_ref.dtype)


# ---------------------------------------------------------------------------
# Tiling / VMEM helpers
# ---------------------------------------------------------------------------
def _round_up(v: int, m: int) -> int:
    return (v + m - 1) // m * m


def _vmem_capacity_bytes() -> int:
    try:
        return int(pltpu.get_tpu_info().vmem_capacity_bytes)
    except Exception:
        return 64 * 1024 * 1024          # conservative (v7x-sized) fallback


def _estimate_vmem(c1, h, w, tc2, in_bytes, use_kron) -> int:
    f32 = 4
    hw, oh, ow = h * w, 2 * h, 2 * w
    ohw = oh * ow
    blocks = (2 * c1 * hw * in_bytes            # x block (double-buffered)
              + 2 * tc2 * c1 * in_bytes         # weight block
              + 2 * tc2 * f32                   # bias block
              + 2 * tc2 * ohw * in_bytes)       # output block
    if use_kron:
        blocks += 2 * hw * ohw * f32            # KT (resident)
        interm = (tc2 * hw + 2 * tc2 * ohw) * f32
    else:
        blocks += 2 * (oh * h + w * ow) * f32   # Ry, Rx^T (resident)
        interm = (2 * tc2 * hw + oh * tc2 * w + oh * tc2 * ow
                  + 2 * tc2 * ohw) * f32
    return blocks + interm


# ---------------------------------------------------------------------------
# Wrapper
# ---------------------------------------------------------------------------
def upblock_forward(x, weight, bias, *, c2_tile=None):
    """UpBlock (bilinear=True) forward: 1x1 conv + 2x bilinear upsample
    (align_corners=True).
      x: (N, C1, H, W), weight: (C2, C1, 1, 1), bias: (C2,)
      -> (N, C2, 2H, 2W), same dtype as x."""
    n, c1, h, w = x.shape
    c2 = weight.shape[0]
    oh, ow = 2 * h, 2 * w
    hw, ohw = h * w, oh * ow

    io_dtype = x.dtype
    in_bytes = jnp.dtype(io_dtype).itemsize

    # Kronecker (single-matmul) interpolation for small spatial maps; the
    # KT matrix is 4*(HW)*(OHW) bytes so cap it at HW<=1024 (<=16 MiB).
    use_kron = hw <= 1024

    # Generation-aware VMEM budget (v7x: 64 MiB/TC, v5e/v6e: 128 MiB).
    capacity = _vmem_capacity_bytes()
    budget = int(capacity * 0.8)

    # --- pick the C2 tile: MXU-friendly, fits the budget -------------------
    c2_ceil = max(8, _round_up(c2, 8))
    if c2_tile is not None:
        tc2 = c2_tile
        assert tc2 % 8 == 0, "c2_tile must be a multiple of 8"
    else:
        candidates = [t for t in (512, 256, 128, 64, 32, 16, 8) if t <= c2_ceil]
        if not candidates:
            candidates = [8]
        tc2 = candidates[-1]
        for t in candidates:
            if _estimate_vmem(c1, h, w, t, in_bytes, use_kron) <= budget:
                tc2 = t
                break
        # v7x has two TensorCores: make sure the grid has >= 2 points.
        if n == 1 and -(-c2_ceil // tc2) == 1 and tc2 >= 16:
            tc2 //= 2
    # TODO(synk): add a spatial (output-row) grid axis with a 1-row input halo
    # when even tc2=8 exceeds the budget (very large feature maps).

    c2_pad = _round_up(c2, tc2)
    n_c2 = c2_pad // tc2

    est = _estimate_vmem(c1, h, w, tc2, in_bytes, use_kron)
    vmem_limit = int(max(32 * 1024 * 1024, min(budget, int(est * 1.5))))
    vmem_limit = min(vmem_limit, capacity)

    # Wrapper-side layout plumbing (metadata-only reshapes + tiny pads).
    x_flat = x.reshape(n, c1, hw)
    w2d = weight.reshape(c2, c1).astype(io_dtype)
    bcol = bias.reshape(c2, 1).astype(jnp.float32)
    if c2_pad != c2:
        w2d = jnp.pad(w2d, ((0, c2_pad - c2), (0, 0)))
        bcol = jnp.pad(bcol, ((0, c2_pad - c2), (0, 0)))

    ry = _interp_matrix(oh, h)                      # (OH, H)  f32
    rx = _interp_matrix(ow, w)                      # (OW, W)  f32

    compiler_params = pltpu.CompilerParams(
        dimension_semantics=("parallel", "parallel"),
        vmem_limit_bytes=vmem_limit,
    )

    if use_kron:
        kt = jnp.kron(ry, rx).T.astype(jnp.float32)         # (HW, OHW)
        out_flat = pl.pallas_call(
            _upblock_kron_kernel,
            out_shape=jax.ShapeDtypeStruct((n, c2_pad, ohw), io_dtype),
            grid_spec=pltpu.PrefetchScalarGridSpec(
                num_scalar_prefetch=0,
                grid=(n, n_c2),
                in_specs=[
                    # x resident across the C2-tile axis (index_map ignores j)
                    pl.BlockSpec((1, c1, hw), lambda i, j: (i, 0, 0)),
                    pl.BlockSpec((tc2, c1), lambda i, j: (j, 0)),
                    pl.BlockSpec((tc2, 1), lambda i, j: (j, 0)),
                    pl.BlockSpec((hw, ohw), lambda i, j: (0, 0)),
                ],
                out_specs=pl.BlockSpec((1, tc2, ohw), lambda i, j: (i, j, 0)),
            ),
            compiler_params=compiler_params,
        )(x_flat, w2d, bcol, kt)
    else:
        rxt = rx.T                                            # (W, OW)
        out_flat = pl.pallas_call(
            _upblock_sep_kernel,
            out_shape=jax.ShapeDtypeStruct((n, c2_pad, ohw), io_dtype),
            grid_spec=pltpu.PrefetchScalarGridSpec(
                num_scalar_prefetch=0,
                grid=(n, n_c2),
                in_specs=[
                    pl.BlockSpec((1, c1, hw), lambda i, j: (i, 0, 0)),
                    pl.BlockSpec((tc2, c1), lambda i, j: (j, 0)),
                    pl.BlockSpec((tc2, 1), lambda i, j: (j, 0)),
                    pl.BlockSpec((oh, h), lambda i, j: (0, 0)),
                    pl.BlockSpec((w, ow), lambda i, j: (0, 0)),
                ],
                out_specs=pl.BlockSpec((1, tc2, ohw), lambda i, j: (i, j, 0)),
            ),
            compiler_params=compiler_params,
        )(x_flat, w2d, bcol, ry, rxt)

    out = out_flat[:, :c2, :].reshape(n, c2, oh, ow)
    return out

# TODO(synk): bilinear=False branch (nn.ConvTranspose2d k=2,s=2) not implemented.


# ---------------------------------------------------------------------------
# Plain-JAX reference (1x1 conv + bilinear align_corners=True via gather)
# ---------------------------------------------------------------------------
def _reference(x, weight, bias):
    n, c1, h, w = x.shape
    c2 = weight.shape[0]
    oh, ow = 2 * h, 2 * w
    y = jnp.einsum('oc,nchw->nohw', weight.reshape(c2, c1), x) \
        + bias[None, :, None, None]

    sy = jnp.arange(oh, dtype=jnp.float32) * (h - 1) / (oh - 1)
    sx = jnp.arange(ow, dtype=jnp.float32) * (w - 1) / (ow - 1)
    y0 = jnp.clip(jnp.floor(sy).astype(jnp.int32), 0, h - 2)
    x0 = jnp.clip(jnp.floor(sx).astype(jnp.int32), 0, w - 2)
    wy = (sy - y0)[None, None, :, None]
    wx = (sx - x0)[None, None, None, :]

    v00 = y[:, :, y0, :][:, :, :, x0]
    v01 = y[:, :, y0, :][:, :, :, x0 + 1]
    v10 = y[:, :, y0 + 1, :][:, :, :, x0]
    v11 = y[:, :, y0 + 1, :][:, :, :, x0 + 1]
    top = v00 * (1 - wx) + v01 * wx
    bot = v10 * (1 - wx) + v11 * wx
    return top * (1 - wy) + bot * wy


if __name__ == "__main__":
    key = jax.random.PRNGKey(0)
    k_x, k_w, k_b = jax.random.split(key, 3)

    # UpBlock(in_channels1=8, in_channels2=4, ...), bilinear=True path.
    N, C1, C2, H, W = 2, 8, 4, 16, 16
    x = jax.random.normal(k_x, (N, C1, H, W), dtype=jnp.float32)
    weight = jax.random.normal(k_w, (C2, C1, 1, 1), dtype=jnp.float32) * 0.1
    bias = jax.random.normal(k_b, (C2,), dtype=jnp.float32) * 0.1

    # Kronecker (small-spatial) path.
    out = jax.block_until_ready(upblock_forward(x, weight, bias))
    ref = _reference(x, weight, bias)
    assert out.shape == (N, C2, 2 * H, 2 * W), out.shape
    err = float(jnp.max(jnp.abs(out - ref)))
    assert err < 1e-4, f"kron path max err {err}"

    # Separable (large-spatial) fallback path.
    H2 = W2 = 40                      # H*W = 1600 > 1024 -> separable kernel
    x2 = jax.random.normal(k_x, (1, C1, H2, W2), dtype=jnp.float32)
    out2 = jax.block_until_ready(upblock_forward(x2, weight, bias))
    ref2 = _reference(x2, weight, bias)
    assert out2.shape == (1, C2, 2 * H2, 2 * W2), out2.shape
    err2 = float(jnp.max(jnp.abs(out2 - ref2)))
    assert err2 < 1e-4, f"separable path max err {err2}"

    print("KERNEL_OK")
</pallas_src>

<mosaic_0001>
module attributes {stable_mosaic.version = 11 : i64} {
  func.func @_upblock_kron_kernel(%arg0: i32, %arg1: i32, %arg2: memref<1x8x256xf32, #tpu.memory_space<vmem>>, %arg3: memref<8x8xf32, #tpu.memory_space<vmem>>, %arg4: memref<8x1xf32, #tpu.memory_space<vmem>>, %arg5: memref<256x1024xf32, #tpu.memory_space<vmem>>, %arg6: memref<1x8x1024xf32, #tpu.memory_space<vmem>>) attributes {dimension_semantics = [#tpu.dimension_semantics<parallel>, #tpu.dimension_semantics<parallel>], iteration_bounds = array<i64: 2, 1>, scalar_prefetch = 0 : i64, scratch_operands = 0 : i64, tpu.core_type = #tpu.core_type<tc>, window_params = [{transform_indices = @transform_0, window_bounds = array<i64: 1, 8, 256>}, {transform_indices = @transform_1, window_bounds = array<i64: 8, 8>}, {transform_indices = @transform_2, window_bounds = array<i64: 8, 1>}, {pipeline_mode = #tpu.pipeline_mode<synchronous>, transform_indices = @transform_3, window_bounds = array<i64: 256, 1024>}, {transform_indices = @transform_4, window_bounds = array<i64: 1, 8, 1024>}]} {
    %c0 = arith.constant 0 : index
    %c0_0 = arith.constant 0 : index
    %0 = vector.load %arg3[%c0, %c0_0] : memref<8x8xf32, #tpu.memory_space<vmem>>, vector<8x8xf32>
    %c0_1 = arith.constant 0 : index
    %c0_2 = arith.constant 0 : index
    %c0_3 = arith.constant 0 : index
    %1 = vector.load %arg2[%c0_1, %c0_2, %c0_3] : memref<1x8x256xf32, #tpu.memory_space<vmem>>, vector<1x8x256xf32>
    %2 = vector.shape_cast %1 : vector<1x8x256xf32> to vector<8x256xf32>
    %cst = arith.constant dense<0.000000e+00> : vector<8x256xf32>
    %3 = tpu.matmul %0, %2, %cst {dimension_numbers = #tpu.dot_dimension_numbers<[1], [0], [0], [1], [0, 0, 1, 1], [], []>} : vector<8x8xf32>, vector<8x256xf32>, vector<8x256xf32> -> vector<8x256xf32>
    %c0_4 = arith.constant 0 : index
    %c0_5 = arith.constant 0 : index
    %4 = vector.load %arg4[%c0_4, %c0_5] : memref<8x1xf32, #tpu.memory_space<vmem>>, vector<8x1xf32>
    %5 = vector.broadcast %4 : vector<8x1xf32> to vector<8x256xf32>
    %6 = arith.addf %3, %5 : vector<8x256xf32>
    %c0_6 = arith.constant 0 : index
    %c0_7 = arith.constant 0 : index
    %7 = vector.load %arg5[%c0_6, %c0_7] : memref<256x1024xf32, #tpu.memory_space<vmem>>, vector<256x1024xf32>
    %cst_8 = arith.constant dense<0.000000e+00> : vector<8x1024xf32>
    %8 = tpu.matmul %6, %7, %cst_8 {dimension_numbers = #tpu.dot_dimension_numbers<[1], [0], [0], [1], [0, 0, 1, 1], [], []>} : vector<8x256xf32>, vector<256x1024xf32>, vector<8x1024xf32> -> vector<8x1024xf32>
    %c0_9 = arith.constant 0 : index
    %c0_10 = arith.constant 0 : index
    %c0_11 = arith.constant 0 : index
    %9 = vector.load %arg6[%c0_9, %c0_10, %c0_11] : memref<1x8x1024xf32, #tpu.memory_space<vmem>>, vector<1x8x1024xf32>
    %10 = vector.shape_cast %9 : vector<1x8x1024xf32> to vector<8x1024xf32>
    %11 = vector.shape_cast %8 : vector<8x1024xf32> to vector<1x8x1024xf32>
    tpu.vector_store %arg6[%c0_9, %c0_10, %c0_11], %11 {strides = array<i32>} : memref<1x8x1024xf32, #tpu.memory_space<vmem>>, vector<1x8x1024xf32>,
    return
  }
  func.func @transform_0(%arg0: i32, %arg1: i32) -> (i32, i32, i32) {
    %c0_i32 = arith.constant 0 : i32
    %c0_i32_0 = arith.constant 0 : i32
    %c0_i32_1 = arith.constant 0 : i32
    return %arg0, %c0_i32, %c0_i32_0 : i32, i32, i32
  }
  func.func @transform_1(%arg0: i32, %arg1: i32) -> (i32, i32) {
    %c0_i32 = arith.constant 0 : i32
    %c0_i32_0 = arith.constant 0 : i32
    return %arg1, %c0_i32 : i32, i32
  }
  func.func @transform_2(%arg0: i32, %arg1: i32) -> (i32, i32) {
    %c0_i32 = arith.constant 0 : i32
    %c0_i32_0 = arith.constant 0 : i32
    return %arg1, %c0_i32 : i32, i32
  }
  func.func @transform_3(%arg0: i32, %arg1: i32) -> (i32, i32) {
    %c0_i32 = arith.constant 0 : i32
    %c0_i32_0 = arith.constant 0 : i32
    %c0_i32_1 = arith.constant 0 : i32
    return %c0_i32, %c0_i32_0 : i32, i32
  }
  func.func @transform_4(%arg0: i32, %arg1: i32) -> (i32, i32, i32) {
    %c0_i32 = arith.constant 0 : i32
    %c0_i32_0 = arith.constant 0 : i32
    return %arg0, %arg1, %c0_i32 : i32, i32, i32
  }
}

</mosaic_0001>

<bundles_post_ra>
// kernel: tpu_custom_call.1
= control target key start
LH: loop header
LB: loop body
LE: loop exit
PB: predicated region body
PF: predicated region fallthrough
CT: control target
= control target key end

     0   :  { %9 = vsyncpa [#allocation3], 0  ;;  %s1808_s0 = inlined_call_operand.hbm [shape: f32[2,8,256], index: 0, kind: input, shape index: {}]   ;;  %s1809_s1 = inlined_call_operand.vmem [shape: f32[8,8], index: 1, kind: input, shape index: {}]   ;;  %s1810_s2 = inlined_call_operand.vmem [shape: f32[8,1], index: 2, kind: input, shape index: {}]   ;;  %s1811_s3 = inlined_call_operand.hbm [shape: f32[256,1024], index: 3, kind: input, shape index: {}]   ;;  %s1812_s4 = inlined_call_operand.hbm [shape: f32[2,8,1024], index: 4, kind: output, shape index: {}]  }
   0x1   :  { %11 = vsyncpa [#allocation3 + $0x1], 0 }
   0x2   :  { %12 = vsyncpa [#allocation6], 0 }
   0x3   :  { %13 = vsyncpa [#allocation4], 0 }
   0x4   :  { %15 = vsyncpa [#allocation4 + $0x1], 0  ;;  %s1581_s15 = smov 0   ;;  %s1583_s16 = smov 0  }
   0x5   :  { %s1585_s17 = smov 0   ;;  %s1587_s18 = smov 0  }
   0x6   :  { %s1589_s19 = smov 0   ;;  %s1591_s20 = smov 0  }
   0x7 LB: > { %s1047_s21 = sadd.s32 4294967295, %s1547_s20   ;;  %s1048_s22 = sadd.s32 4294967294, %s1547_s20   ;;  %s1547_s20 = sphi %s1591_s20, %s21_s20   ;;  %s1543_s19 = sphi %s1589_s19, %s1836_s19   ;;  %s1539_s18 = sphi %s1587_s18, %s1835_s18   ;;  %s1535_s17 = sphi %s1585_s17, %s1834_s17   ;;  %s1531_s16 = sphi %s1583_s16, %s1833_s16   ;;  %s1527_s15 = sphi %s1581_s15, %s1832_s15  }
   0x8   : > { %p53_p0 = scmp.ne.s32.totalorder %s1531_s16, %s1527_s15  ;;  %p1615_p1 = scmp.eq.s32.totalorder %s1047_s21, 0 }
   0x9   : > { %p1619_p2 = scmp.eq.s32.totalorder %s1047_s21, 1  ;;  %p158_p3 = scmp.eq.s32.totalorder %s1048_s22, 1 }
   0xa   : > { %s1817_s23 = scalar_select %p1615_p1, 1, 0 }
   0xb   : > { %s1818_s24 = scalar_select %p1619_p2, 1, 0 }
   0xc   : > { %p1625_p4 = por %p1615_p1, %p53_p0  ;;  %p1049_p5 = scmp.ge.s32.totalorder %s1547_s20, 1 }
   0xd   : > { %p1630_p6 = por %p158_p3, %p53_p0  ;;  %p165_p7 = scmp.lt.s32.totalorder %s1547_s20, 3 }
   0xe   : > { %s1819_s25 = scalar_select %p1625_p4, 1, 0 }
   0xf   : > { %s1820_s26 = scalar_select %p1630_p6, 1, 0 }
  0x10   : > { %p1635_p8 = pnand %p1049_p5, %p165_p7  ;;  %s1549_s28 = smov [#allocation5]  }
  0x11   : > { %s191_s29 = sshll.u32 %s1549_s28, 4  ;;  %s33_s5 = sadd.s32 1, %s1543_s19  ;;  %s192_s29 = int_to_ptr.vmem [resolvable:$true] %s191_s29 }
  0x12   : > { %s1821_s27 = scalar_select %p1635_p8, 1, 0 }
  0x13   : > { %p1333_p9 = pneg %p1635_p8  ;;  %s1403_s8 = scalar_lea.hbm %s1811_s3, 32768 }
  0x14   : > { %p1404_p12 = scmp.ne.s32.totalorder %s1811_s3, %s1403_s8  ;;  %p1410_p5 = scmp.lt.u32.totalorder %s1403_s8, %s1811_s3 }
  0x15   : > { %p1644_p11 = pnand %p1333_p9, %p1615_p1 }
  0x17   : > { %p1405_p13 = pneg %p1644_p11 }
  0x19   : > { %p1406_p0 = pnand %p1405_p13, %p1404_p12 }
  0x1b   : > { %p1407_p3 = pneg %p1406_p0 }
  0x1d   : > { %p1412_p7 = pnand %p1410_p5, %p1407_p3 }
  0x1f   : > { %1415 = shalt.err (!%p1412_p7)
}
  0x20   : > { %s1416_s13 = scalar_lea.vmem %s192_s29, 32768  ;;  %p1424_p1 = scmp.lt.s32.totalorder %s192_s29, %s192_s29 }
  0x21   : > { %p1417_p9 = scmp.ne.s32.totalorder %s192_s29, %s1416_s13  ;;  %p1425_p4 = scmp.lt.s32.totalorder %s1416_s13, %s1416_s13 }
  0x23   : > { %p1419_p10 = pnand %p1417_p9, %p1405_p13  ;;  %p1426_p8 = por %p1425_p4, %p1424_p1 }
  0x25   : > { %p1420_p6 = pneg %p1419_p10 }
  0x27   : > { %p1427_p2 = pnand %p1426_p8, %p1420_p6 }
  0x29   : > { %1430 = shalt.err (!%p1427_p2)
}
  0x2a   : > { %s1550_s14 = smov 1024   ;;  %s1551_s21 = smov 64  }
  0x2b   : > { %1336 = dma.hbm_to_vmem [thread:$0]  (!%p1644_p11), %s1811_s3, 32768, %s192_s29, [#allocation6], %s1550_s14, %s1550_s14, %s1551_s21  }
  0x2c   : > { %p35_p1 = scmp.ge.s32.totalorder %s33_s5, 2  ;;  %s40_s6 = sadd.s32 1, %s1535_s17 }
  0x2d   : > { %p47_p2 = scmp.ne.s32.totalorder %s1535_s17, %s1531_s16  ;;  %p48_p4 = scmp.eq.s32.totalorder %s1547_s20, 0 }
  0x2e   : > { %s1838_s5 = smov (%p35_p1, %s33_s5), 0  ;;  %p1824_p8 = scmp.ne.s32.totalorder %s1818_s24, 0 }
  0x2f   : > { %p1671_p6 = por %p48_p4, %p47_p2  ;;  %s37_s30 = ssub.s32 %s1543_s19, %s1838_s5 }
  0x30   : > { %p1677_p10 = por %p1824_p8, %p47_p2  ;;  %p1346_p12 = scmp.lt.s32.totalorder %s1547_s20, 2 }
  0x31   : > { %p38_p11 = scmp.eq.s32.totalorder %s37_s30, 0  ;;  %s205_s29 = sand.u32 1, %s1535_s17  }
  0x32   : > { %s1054_s9 = sshll.u32 %s205_s29, 4  ;;  %s1067_s11 = sshll.u32 %s1543_s19, 8 }
  0x33   : > { %s1686_s10 = scalar_select %p38_p11, %s1535_s17, %s40_s6  }
  0x34   : > { %s1692_s14 = scalar_lea.hbm %s1808_s0, %s1067_s11  ;;  %s209_s24 = scalar_lea.vmem [#allocation2], %s1054_s9 }
  0x35   : > { %s217_s21 = sshll.u32 %s209_s24, 4  ;;  %p1698_p13 = pnand %p1346_p12, %p1671_p6  ;;  %s1694_s21 = int_to_ptr.vmem [resolvable:$true] %s217_s21 }
  0x36   : > { %s206_s28 = scalar_lea.sflag [#allocation3], %s205_s29  ;;  %s1431_s6 = scalar_lea.hbm %s1692_s14, 256 }
  0x37   : > { %p1432_p0 = scmp.ne.s32.totalorder %s1692_s14, %s1431_s6  ;;  %p1433_p3 = pneg %p1698_p13 }
  0x38   : > { %s1436_s11 = scalar_lea.hbm %s1808_s0, 512  ;;  %p1437_p9 = scmp.lt.u32.totalorder %s1692_s14, %s1808_s0 }
  0x39   : > { %p1434_p5 = pnand %p1433_p3, %p1432_p0  ;;  %p1438_p1 = scmp.lt.u32.totalorder %s1436_s11, %s1431_s6 }
  0x3a   : > { %p1440_p4 = scmp.lt.u32.totalorder %s1431_s6, %s1692_s14 }
  0x3b   : > { %p1435_p7 = pneg %p1434_p5  ;;  %p1439_p2 = por %p1438_p1, %p1437_p9 }
  0x3d   : > { %p1441_p6 = por %p1440_p4, %p1439_p2 }
  0x3f   : > { %p1442_p8 = pnand %p1441_p6, %p1435_p7 }
  0x41   : > { %1445 = shalt.err (!%p1442_p8)
}
  0x42   : > { %s1446_s29 = scalar_lea.vmem %s1694_s21, 256  ;;  %s1552_s13 = smov [#allocation2]  }
  0x43   : > { %p1447_p12 = scmp.ne.s32.totalorder %s1694_s21, %s1446_s29  ;;  %s1451_s24 = sshll.u32 %s1552_s13, 4  ;;  %s1452_s24 = int_to_ptr.vmem [resolvable:$false] %s1451_s24 }
  0x44   : > { %s1453_s30 = scalar_lea.vmem %s1452_s24, 512  ;;  %p1454_p5 = scmp.lt.s32.totalorder %s1694_s21, %s1452_s24 }
  0x45   : > { %p1449_p11 = pnand %p1447_p12, %p1433_p3  ;;  %p1455_p9 = scmp.lt.s32.totalorder %s1453_s30, %s1446_s29 }
  0x47   : > { %p1450_p0 = pneg %p1449_p11  ;;  %p1456_p1 = por %p1455_p9, %p1454_p5 }
  0x49   : > { %p1457_p2 = pnand %p1456_p1, %p1450_p0 }
  0x4b   : > { %1460 = shalt.err (!%p1457_p2)
}
  0x4c   : > { %1340 = dma.hbm_to_vmem [thread:$0]  (!%p1698_p13), %s1692_s14, 256, %s1694_s21, %s206_s28  }
  0x4d   : > { %p1827_p7 = scmp.ne.s32.totalorder %s1821_s27, 0 }
  0x4e   : > { %s1730_s6 = sand.u32 (!%p1827_p7), 1, %s1531_s16   ;;  %p1828_p3 = scmp.ne.s32.totalorder (!%p1827_p7), %s1819_s25, 0 }
  0x4f   : > { %226 = sbr.rel (%p1827_p7) target bundleno = 601 (0x259), region = 36  ;;  %s1058_s9 = sshll.u32 (!%p1827_p7), %s1730_s6, 4 }
  0x50   : > { %s229_s11 = scalar_lea.sflag (!%p1827_p7), [#allocation3], %s1730_s6  ;;  %s232_s7 = scalar_lea.vmem (!%p1827_p7), [#allocation2], %s1058_s9 }
  0x56   : > { %1514 = dma.done.wait (%p1828_p3), %s229_s11, 256  }
  0x57   : > { %1516 = vsyncadd (%p1828_p3), %s229_s11, 4294967040  ;;  %p1829_p4 = scmp.ne.s32.totalorder %s1817_s23, 0 }
  0x59   : > { %1518 = dma.done.wait (%p1829_p4), [#allocation6], 32768  }
  0x5a   : > { %1520 = vsyncadd (%p1829_p4), [#allocation6], 4294934528  ;;  %v1553_v0 = vmov 0.0   ;;  %v1554_v1 = vmov 0   ;;  %v279_v2 = vld [vmem:[%s232_s7 + $0x8] sm:$0xff]  ;;  %v278_v3 = vld [vmem:[%s232_s7] sm:$0xff] }
  0x5b   : > { %354 = vmatprep.mubr.f32.mxu0 %v1553_v0  ;;  %1402 = vset.pattern.permute.xlu0 %v1554_v1  ;;  %v277_v4 = vld [vmem:[%s1809_s1] sm:$0xff]  ;;  %vm286_vm0 = vcmask 64512   ;;  %v362_v6 = vld [vmem:[#allocation5 + $0x8] sm:$0xff]  ;;  %v364_v9 = vld [vmem:[#allocation5 + $0x18] sm:$0xff]  ;;  %s1060_s23 = sshll.u32 %s1730_s6, 6  ;;  %s1068_s28 = sshll.u32 %s1539_s18, 10 }
  0x5c   : > { %290 = vmatprep.subr.mxu0 %v279_v2  ;;  %v280_v5 = vld [vmem:[%s1810_s2] sm:$0xff]  ;;  %v370_v7 = vld [vmem:[#allocation5 + $0x48] sm:$0xff]  ;;  %v372_v10 = vld [vmem:[#allocation5 + $0x58] sm:$0xff]  ;;  %s268_s22 = scalar_lea.vmem [#allocation7], %s1060_s23  ;;  %s1759_s24 = scalar_lea.hbm %s1812_s4, %s1068_s28 }
  0x5d   : > { %291 = vmatpush1.msra.mxu0 %v278_v3  ;;  %283 = vperm.xlu0 %1402, %v280_v5   ;;  %v1069_v8 = vpack.c.bf16 %v370_v7, %v362_v6  ;;  %v361_v11 = vld [vmem:[#allocation5] sm:$0xff]  ;;  %v1133_v12 = vpack.c.bf16 %v372_v10, %v364_v9  ;;  %v363_v14 = vld [vmem:[#allocation5 + $0x10] sm:$0xff]  ;;  %v378_v18 = vld [vmem:[#allocation5 + $0x88] sm:$0xff]  ;;  %s926_s12 = sshll.u32 %s268_s22, 4  ;;  %s910_s18 = scalar_lea.sflag [#allocation4], %s1730_s6  ;;  %s1761_s12 = int_to_ptr.vmem [resolvable:$true] %s926_s12 }
  0x5e   : > { %1061 = vmatmul.mubr.msk.f32.vlgmr.msra.gmra.mrb[0].mxu0 %vm286_vm0, %v277_v4  ;;  %v369_v13 = vld [vmem:[#allocation5 + $0x40] sm:$0xff]  ;;  %v371_v15 = vld [vmem:[#allocation5 + $0x50] sm:$0xff]  ;;  %v386_v19 = vld [vmem:[#allocation5 + $0xc8] sm:$0xff]  ;;  %s1461_s30 = scalar_lea.vmem %s1761_s12, 1024  ;;  %s1555_s9 = smov [#allocation7]  }
  0x5f   : > { %1070 = vmatprep.subr.bf16.mxu1 %v1069_v8  ;;  %v1071_v16 = vpack.c.bf16 %v369_v13, %v361_v11  ;;  %v1135_v17 = vpack.c.bf16 %v371_v15, %v363_v14  ;;  %v380_v20 = vld [vmem:[#allocation5 + $0x98] sm:$0xff]  ;;  %1134 = vmatprep.subr.bf16.mxu0 %v1133_v12  ;;  %v1073_v21 = vpack.c.bf16 %v386_v19, %v378_v18  ;;  %v377_v23 = vld [vmem:[#allocation5 + $0x80] sm:$0xff]  ;;  %v379_v27 = vld [vmem:[#allocation5 + $0x90] sm:$0xff]  ;;  %p1462_p13 = scmp.ne.s32.totalorder %s1761_s12, %s1461_s30  ;;  %s1465_s11 = sshll.u32 %s1555_s9, 4  ;;  %s1466_s11 = int_to_ptr.vmem [resolvable:$false] %s1465_s11 }
  0x60   : > { %v388_v22 = vld [vmem:[#allocation5 + $0xd8] sm:$0xff]  ;;  %v385_v24 = vld [vmem:[#allocation5 + $0xc0] sm:$0xff]  ;;  %v387_v28 = vld [vmem:[#allocation5 + $0xd0] sm:$0xff]  ;;  %s1467_s7 = scalar_lea.vmem %s1466_s11, 2048  ;;  %p1468_p12 = scmp.lt.s32.totalorder %s1761_s12, %s1466_s11 }
  0x61   : > { %1072 = vmatpush1.bf16.msra.mxu1 %v1071_v16  ;;  %1136 = vmatpush1.bf16.msra.mxu0 %v1135_v17  ;;  %v1137_v25 = vpack.c.bf16 %v388_v22, %v380_v20  ;;  %v1075_v26 = vpack.c.bf16 %v385_v24, %v377_v23  ;;  %v394_v29 = vld [vmem:[#allocation5 + $0x108] sm:$0xff]  ;;  %v1139_v30 = vpack.c.bf16 %v387_v28, %v379_v27  ;;  %v396_v32 = vld [vmem:[#allocation5 + $0x118] sm:$0xff]  ;;  %v393_v36 = vld [vmem:[#allocation5 + $0x100] sm:$0xff]  ;;  %p1463_p6 = pnand %p1462_p13, %p1677_p10  ;;  %p1469_p11 = scmp.lt.s32.totalorder %s1467_s7, %s1461_s30 }
  0x62   : > { %1074 = vmatprep.subr.bf16.mxu1 %v1073_v21  ;;  %v402_v31 = vld [vmem:[#allocation5 + $0x148] sm:$0xff]  ;;  %v404_v33 = vld [vmem:[#allocation5 + $0x158] sm:$0xff]  ;;  %v401_v37 = vld [vmem:[#allocation5 + $0x140] sm:$0xff] }
  0x63   : > { %1138 = vmatprep.subr.bf16.mxu0 %v1137_v25  ;;  %v1077_v34 = vpack.c.bf16 %v402_v31, %v394_v29  ;;  %v1141_v35 = vpack.c.bf16 %v404_v33, %v396_v32  ;;  %v395_v38 = vld [vmem:[#allocation5 + $0x110] sm:$0xff]  ;;  %v410_v40 = vld [vmem:[#allocation5 + $0x188] sm:$0xff]  ;;  %v1079_v42 = vpack.c.bf16 %v401_v37, %v393_v36  ;;  %v412_v44 = vld [vmem:[#allocation5 + $0x198] sm:$0xff]  ;;  %p1464_p8 = pneg %p1463_p6  ;;  %p1470_p0 = por %p1469_p11, %p1468_p12 }
  0x64   : > { %v403_v39 = vld [vmem:[#allocation5 + $0x150] sm:$0xff]  ;;  %v418_v41 = vld [vmem:[#allocation5 + $0x1c8] sm:$0xff]  ;;  %v420_v45 = vld [vmem:[#allocation5 + $0x1d8] sm:$0xff] }
  0x65   : > { %1076 = vmatpush1.bf16.msra.mxu1 %v1075_v26  ;;  %1140 = vmatpush1.bf16.msra.mxu0 %v1139_v30  ;;  %v1143_v43 = vpack.c.bf16 %v403_v39, %v395_v38  ;;  %v409_v46 = vld [vmem:[#allocation5 + $0x180] sm:$0xff]  ;;  %v1081_v47 = vpack.c.bf16 %v418_v41, %v410_v40  ;;  %v1145_v48 = vpack.c.bf16 %v420_v45, %v412_v44  ;;  %v411_v50 = vld [vmem:[#allocation5 + $0x190] sm:$0xff]  ;;  %v426_v52 = vld [vmem:[#allocation5 + $0x208] sm:$0xff]  ;;  %p1471_p5 = pnand %p1470_p0, %p1464_p8 }
  0x66   : > { %1078 = vmatprep.subr.bf16.mxu1 %v1077_v34  ;;  %1142 = vmatprep.subr.bf16.mxu0 %v1141_v35  ;;  %v417_v49 = vld [vmem:[#allocation5 + $0x1c0] sm:$0xff]  ;;  %v419_v51 = vld [vmem:[#allocation5 + $0x1d0] sm:$0xff]  ;;  %v434_v53 = vld [vmem:[#allocation5 + $0x248] sm:$0xff] }
  0x67   : > { %v428_v54 = vld [vmem:[#allocation5 + $0x218] sm:$0xff]  ;;  %v1083_v56 = vpack.c.bf16 %v417_v49, %v409_v46  ;;  %v1147_v57 = vpack.c.bf16 %v419_v51, %v411_v50  ;;  %v425_v58 = vld [vmem:[#allocation5 + $0x200] sm:$0xff]  ;;  %v1085_v60 = vpack.c.bf16 %v434_v53, %v426_v52  ;;  %v427_v62 = vld [vmem:[#allocation5 + $0x210] sm:$0xff] }
  0x68   : > { %v436_v55 = vld [vmem:[#allocation5 + $0x258] sm:$0xff]  ;;  %v433_v59 = vld [vmem:[#allocation5 + $0x240] sm:$0xff]  ;;  %v435_v63 = vld [vmem:[#allocation5 + $0x250] sm:$0xff] }
  0x69   : > { %1080 = vmatpush1.bf16.msra.mxu1 %v1079_v42  ;;  %1144 = vmatpush1.bf16.msra.mxu0 %v1143_v43  ;;  %v1149_v61 = vpack.c.bf16 %v436_v55, %v428_v54  ;;  %v442_v0 = vld [vmem:[#allocation5 + $0x288] sm:$0xff]  ;;  %v444_v2 = vld [vmem:[#allocation5 + $0x298] sm:$0xff]  ;;  %v1087_v4 = vpack.c.bf16 %v433_v59, %v425_v58  ;;  %v1151_v5 = vpack.c.bf16 %v435_v63, %v427_v62  ;;  %v441_v6 = vld [vmem:[#allocation5 + $0x280] sm:$0xff] }
  0x6a   : > { %1082 = vmatprep.subr.bf16.mxu1 %v1081_v47  ;;  %1146 = vmatprep.subr.bf16.mxu0 %v1145_v48  ;;  %v450_v1 = vld [vmem:[#allocation5 + $0x2c8] sm:$0xff]  ;;  %v452_v3 = vld [vmem:[#allocation5 + $0x2d8] sm:$0xff]  ;;  %v449_v7 = vld [vmem:[#allocation5 + $0x2c0] sm:$0xff] }
  0x6b   : > { %v1089_v8 = vpack.c.bf16 %v450_v1, %v442_v0  ;;  %v1153_v9 = vpack.c.bf16 %v452_v3, %v444_v2  ;;  %v443_v10 = vld [vmem:[#allocation5 + $0x290] sm:$0xff]  ;;  %v458_v12 = vld [vmem:[#allocation5 + $0x308] sm:$0xff]  ;;  %v460_v14 = vld [vmem:[#allocation5 + $0x318] sm:$0xff]  ;;  %v1091_v16 = vpack.c.bf16 %v449_v7, %v441_v6 }
  0x6c   : > { %v451_v11 = vld [vmem:[#allocation5 + $0x2d0] sm:$0xff]  ;;  %v466_v13 = vld [vmem:[#allocation5 + $0x348] sm:$0xff]  ;;  %v468_v15 = vld [vmem:[#allocation5 + $0x358] sm:$0xff] }
  0x6d   : > { %1084 = vmatpush1.bf16.msra.mxu1 %v1083_v56  ;;  %1148 = vmatpush1.bf16.msra.mxu0 %v1147_v57  ;;  %v1155_v17 = vpack.c.bf16 %v451_v11, %v443_v10  ;;  %v457_v18 = vld [vmem:[#allocation5 + $0x300] sm:$0xff]  ;;  %v1093_v20 = vpack.c.bf16 %v466_v13, %v458_v12  ;;  %v1157_v21 = vpack.c.bf16 %v468_v15, %v460_v14  ;;  %v459_v22 = vld [vmem:[#allocation5 + $0x310] sm:$0xff]  ;;  %v474_v24 = vld [vmem:[#allocation5 + $0x388] sm:$0xff] }
  0x6e   : > { %1086 = vmatprep.subr.bf16.mxu1 %v1085_v60  ;;  %1150 = vmatprep.subr.bf16.mxu0 %v1149_v61  ;;  %v465_v19 = vld [vmem:[#allocation5 + $0x340] sm:$0xff]  ;;  %v467_v23 = vld [vmem:[#allocation5 + $0x350] sm:$0xff]  ;;  %v482_v25 = vld [vmem:[#allocation5 + $0x3c8] sm:$0xff] }
  0x6f   : > { %v476_v26 = vld [vmem:[#allocation5 + $0x398] sm:$0xff]  ;;  %v1095_v28 = vpack.c.bf16 %v465_v19, %v457_v18  ;;  %v1159_v29 = vpack.c.bf16 %v467_v23, %v459_v22  ;;  %v473_v30 = vld [vmem:[#allocation5 + $0x380] sm:$0xff]  ;;  %v1097_v32 = vpack.c.bf16 %v482_v25, %v474_v24  ;;  %v475_v34 = vld [vmem:[#allocation5 + $0x390] sm:$0xff] }
  0x70   : > { %v484_v27 = vld [vmem:[#allocation5 + $0x3d8] sm:$0xff]  ;;  %v481_v31 = vld [vmem:[#allocation5 + $0x3c0] sm:$0xff]  ;;  %v483_v35 = vld [vmem:[#allocation5 + $0x3d0] sm:$0xff] }
  0x71   : > { %1088 = vmatpush1.bf16.msra.mxu1 %v1087_v4  ;;  %1152 = vmatpush1.bf16.msra.mxu0 %v1151_v5  ;;  %v1161_v33 = vpack.c.bf16 %v484_v27, %v476_v26  ;;  %v490_v36 = vld [vmem:[#allocation5 + $0x408] sm:$0xff]  ;;  %v492_v38 = vld [vmem:[#allocation5 + $0x418] sm:$0xff]  ;;  %v1099_v40 = vpack.c.bf16 %v481_v31, %v473_v30  ;;  %v1163_v41 = vpack.c.bf16 %v483_v35, %v475_v34  ;;  %v489_v42 = vld [vmem:[#allocation5 + $0x400] sm:$0xff] }
  0x72   : > { %1090 = vmatprep.subr.bf16.mxu1 %v1089_v8  ;;  %1154 = vmatprep.subr.bf16.mxu0 %v1153_v9  ;;  %v498_v37 = vld [vmem:[#allocation5 + $0x448] sm:$0xff]  ;;  %v500_v39 = vld [vmem:[#allocation5 + $0x458] sm:$0xff]  ;;  %v497_v43 = vld [vmem:[#allocation5 + $0x440] sm:$0xff] }
  0x73   : > { %v1101_v44 = vpack.c.bf16 %v498_v37, %v490_v36  ;;  %v1165_v45 = vpack.c.bf16 %v500_v39, %v492_v38  ;;  %v491_v46 = vld [vmem:[#allocation5 + $0x410] sm:$0xff]  ;;  %v506_v48 = vld [vmem:[#allocation5 + $0x488] sm:$0xff]  ;;  %v508_v50 = vld [vmem:[#allocation5 + $0x498] sm:$0xff]  ;;  %v1103_v52 = vpack.c.bf16 %v497_v43, %v489_v42 }
  0x74   : > { %v499_v47 = vld [vmem:[#allocation5 + $0x450] sm:$0xff]  ;;  %v514_v49 = vld [vmem:[#allocation5 + $0x4c8] sm:$0xff]  ;;  %v516_v51 = vld [vmem:[#allocation5 + $0x4d8] sm:$0xff] }
  0x75   : > { %1092 = vmatpush1.bf16.msra.mxu1 %v1091_v16  ;;  %1156 = vmatpush1.bf16.msra.mxu0 %v1155_v17  ;;  %v1167_v53 = vpack.c.bf16 %v499_v47, %v491_v46  ;;  %v505_v54 = vld [vmem:[#allocation5 + $0x480] sm:$0xff]  ;;  %v1105_v56 = vpack.c.bf16 %v514_v49, %v506_v48  ;;  %v1169_v57 = vpack.c.bf16 %v516_v51, %v508_v50  ;;  %v507_v58 = vld [vmem:[#allocation5 + $0x490] sm:$0xff]  ;;  %v522_v60 = vld [vmem:[#allocation5 + $0x508] sm:$0xff] }
  0x76   : > { %1094 = vmatprep.subr.bf16.mxu1 %v1093_v20  ;;  %1158 = vmatprep.subr.bf16.mxu0 %v1157_v21  ;;  %v513_v55 = vld [vmem:[#allocation5 + $0x4c0] sm:$0xff]  ;;  %v515_v59 = vld [vmem:[#allocation5 + $0x4d0] sm:$0xff]  ;;  %v530_v61 = vld [vmem:[#allocation5 + $0x548] sm:$0xff] }
  0x77   : > { %v524_v62 = vld [vmem:[#allocation5 + $0x518] sm:$0xff]  ;;  %v1107_v0 = vpack.c.bf16 %v513_v55, %v505_v54  ;;  %v1171_v1 = vpack.c.bf16 %v515_v59, %v507_v58  ;;  %v521_v2 = vld [vmem:[#allocation5 + $0x500] sm:$0xff]  ;;  %v1109_v4 = vpack.c.bf16 %v530_v61, %v522_v60  ;;  %v523_v6 = vld [vmem:[#allocation5 + $0x510] sm:$0xff] }
  0x78   : > { %v532_v63 = vld [vmem:[#allocation5 + $0x558] sm:$0xff]  ;;  %v529_v3 = vld [vmem:[#allocation5 + $0x540] sm:$0xff]  ;;  %v531_v7 = vld [vmem:[#allocation5 + $0x550] sm:$0xff] }
  0x79   : > { %1096 = vmatpush1.bf16.msra.mxu1 %v1095_v28  ;;  %1160 = vmatpush1.bf16.msra.mxu0 %v1159_v29  ;;  %v1173_v5 = vpack.c.bf16 %v532_v63, %v524_v62  ;;  %v538_v8 = vld [vmem:[#allocation5 + $0x588] sm:$0xff]  ;;  %v540_v10 = vld [vmem:[#allocation5 + $0x598] sm:$0xff]  ;;  %v1111_v12 = vpack.c.bf16 %v529_v3, %v521_v2  ;;  %v1175_v13 = vpack.c.bf16 %v531_v7, %v523_v6  ;;  %v537_v14 = vld [vmem:[#allocation5 + $0x580] sm:$0xff] }
  0x7a   : > { %1098 = vmatprep.subr.bf16.mxu1 %v1097_v32  ;;  %1162 = vmatprep.subr.bf16.mxu0 %v1161_v33  ;;  %v546_v9 = vld [vmem:[#allocation5 + $0x5c8] sm:$0xff]  ;;  %v548_v11 = vld [vmem:[#allocation5 + $0x5d8] sm:$0xff]  ;;  %v545_v15 = vld [vmem:[#allocation5 + $0x5c0] sm:$0xff] }
  0x7b   : > { %v1113_v16 = vpack.c.bf16 %v546_v9, %v538_v8  ;;  %v1177_v17 = vpack.c.bf16 %v548_v11, %v540_v10  ;;  %v539_v18 = vld [vmem:[#allocation5 + $0x590] sm:$0xff]  ;;  %v554_v20 = vld [vmem:[#allocation5 + $0x608] sm:$0xff]  ;;  %v556_v22 = vld [vmem:[#allocation5 + $0x618] sm:$0xff]  ;;  %v1115_v24 = vpack.c.bf16 %v545_v15, %v537_v14 }
  0x7c   : > { %v547_v19 = vld [vmem:[#allocation5 + $0x5d0] sm:$0xff]  ;;  %v562_v21 = vld [vmem:[#allocation5 + $0x648] sm:$0xff]  ;;  %v564_v23 = vld [vmem:[#allocation5 + $0x658] sm:$0xff] }
  0x7d   : > { %1100 = vmatpush1.bf16.msra.mxu1 %v1099_v40  ;;  %1164 = vmatpush1.bf16.msra.mxu0 %v1163_v41  ;;  %v1179_v25 = vpack.c.bf16 %v547_v19, %v539_v18  ;;  %v553_v26 = vld [vmem:[#allocation5 + $0x600] sm:$0xff]  ;;  %v1117_v28 = vpack.c.bf16 %v562_v21, %v554_v20  ;;  %v1181_v29 = vpack.c.bf16 %v564_v23, %v556_v22  ;;  %v555_v30 = vld [vmem:[#allocation5 + $0x610] sm:$0xff]  ;;  %v570_v32 = vld [vmem:[#allocation5 + $0x688] sm:$0xff] }
  0x7e   : > { %1102 = vmatprep.subr.bf16.mxu1 %v1101_v44  ;;  %1166 = vmatprep.subr.bf16.mxu0 %v1165_v45  ;;  %v561_v27 = vld [vmem:[#allocation5 + $0x640] sm:$0xff]  ;;  %v563_v31 = vld [vmem:[#allocation5 + $0x650] sm:$0xff]  ;;  %v578_v33 = vld [vmem:[#allocation5 + $0x6c8] sm:$0xff] }
  0x7f   : > { %v572_v34 = vld [vmem:[#allocation5 + $0x698] sm:$0xff]  ;;  %v1119_v36 = vpack.c.bf16 %v561_v27, %v553_v26  ;;  %v1183_v37 = vpack.c.bf16 %v563_v31, %v555_v30  ;;  %v569_v38 = vld [vmem:[#allocation5 + $0x680] sm:$0xff]  ;;  %v1121_v40 = vpack.c.bf16 %v578_v33, %v570_v32  ;;  %v571_v42 = vld [vmem:[#allocation5 + $0x690] sm:$0xff] }
  0x80   : > { %v580_v35 = vld [vmem:[#allocation5 + $0x6d8] sm:$0xff]  ;;  %v577_v39 = vld [vmem:[#allocation5 + $0x6c0] sm:$0xff]  ;;  %v579_v43 = vld [vmem:[#allocation5 + $0x6d0] sm:$0xff] }
  0x81   : > { %1104 = vmatpush1.bf16.msra.mxu1 %v1103_v52  ;;  %1168 = vmatpush1.bf16.msra.mxu0 %v1167_v53  ;;  %v1185_v41 = vpack.c.bf16 %v580_v35, %v572_v34  ;;  %v586_v44 = vld [vmem:[#allocation5 + $0x708] sm:$0xff]  ;;  %v588_v46 = vld [vmem:[#allocation5 + $0x718] sm:$0xff]  ;;  %v1123_v48 = vpack.c.bf16 %v577_v39, %v569_v38  ;;  %v1187_v49 = vpack.c.bf16 %v579_v43, %v571_v42  ;;  %v585_v50 = vld [vmem:[#allocation5 + $0x700] sm:$0xff] }
  0x82   : > { %1106 = vmatprep.subr.bf16.mxu1 %v1105_v56  ;;  %1170 = vmatprep.subr.bf16.mxu0 %v1169_v57  ;;  %v594_v45 = vld [vmem:[#allocation5 + $0x748] sm:$0xff]  ;;  %v596_v47 = vld [vmem:[#allocation5 + $0x758] sm:$0xff]  ;;  %v593_v53 = vld [vmem:[#allocation5 + $0x740] sm:$0xff] }
  0x83   : > { %v1125_v51 = vpack.c.bf16 %v594_v45, %v586_v44  ;;  %v1189_v52 = vpack.c.bf16 %v596_v47, %v588_v46  ;;  %v587_v54 = vld [vmem:[#allocation5 + $0x710] sm:$0xff]  ;;  %v602_v56 = vld [vmem:[#allocation5 + $0x788] sm:$0xff]  ;;  %v1127_v58 = vpack.c.bf16 %v593_v53, %v585_v50  ;;  %v604_v61 = vld [vmem:[#allocation5 + $0x798] sm:$0xff] }
  0x84   : > { %v595_v55 = vld [vmem:[#allocation5 + $0x750] sm:$0xff]  ;;  %v610_v57 = vld [vmem:[#allocation5 + $0x7c8] sm:$0xff]  ;;  %v612_v62 = vld [vmem:[#allocation5 + $0x7d8] sm:$0xff] }
  0x85   : > { %1108 = vmatpush1.bf16.msra.mxu1 %v1107_v0  ;;  %1172 = vmatpush1.bf16.msra.mxu0 %v1171_v1  ;;  %v1191_v59 = vpack.c.bf16 %v595_v55, %v587_v54  ;;  %v1129_v60 = vpack.c.bf16 %v610_v57, %v602_v56  ;;  %v1193_v63 = vpack.c.bf16 %v612_v62, %v604_v61  ;;  %v601_v0 = vld [vmem:[#allocation5 + $0x780] sm:$0xff]  ;;  %v603_v2 = vld [vmem:[#allocation5 + $0x790] sm:$0xff]  ;;  %v366_v6 = vld [vmem:[#allocation5 + $0x28] sm:$0xff] }
  0x86   : > { %1110 = vmatprep.subr.bf16.mxu1 %v1109_v4  ;;  %1174 = vmatprep.subr.bf16.mxu0 %v1173_v5  ;;  %v609_v1 = vld [vmem:[#allocation5 + $0x7c0] sm:$0xff]  ;;  %v611_v4 = vld [vmem:[#allocation5 + $0x7d0] sm:$0xff]  ;;  %v374_v7 = vld [vmem:[#allocation5 + $0x68] sm:$0xff] }
  0x87   : > { %v1131_v3 = vpack.c.bf16 %v609_v1, %v601_v0  ;;  %v1195_v5 = vpack.c.bf16 %v611_v4, %v603_v2  ;;  %v368_v8 = vld [vmem:[#allocation5 + $0x38] sm:$0xff]  ;;  %v1197_v9 = vpack.c.bf16 %v374_v7, %v366_v6  ;;  %v373_v14 = vld [vmem:[#allocation5 + $0x60] sm:$0xff]  ;;  %v367_v15 = vld [vmem:[#allocation5 + $0x30] sm:$0xff] }
  0x88   : > { %v376_v10 = vld [vmem:[#allocation5 + $0x78] sm:$0xff]  ;;  %v382_v18 = vld [vmem:[#allocation5 + $0xa8] sm:$0xff]  ;;  %v381_v26 = vld [vmem:[#allocation5 + $0xa0] sm:$0xff] }
  0x89   : > { %1112 = vmatpush1.bf16.msra.mxu1 %v1111_v12  ;;  %1176 = vmatpush1.bf16.msra.mxu0 %v1175_v13  ;;  %v1261_v11 = vpack.c.bf16 %v376_v10, %v368_v8  ;;  %v365_v12 = vld [vmem:[#allocation5 + $0x20] sm:$0xff]  ;;  %v390_v20 = vld [vmem:[#allocation5 + $0xe8] sm:$0xff]  ;;  %v384_v21 = vld [vmem:[#allocation5 + $0xb8] sm:$0xff] }
  0x8a   : > { %1114 = vmatprep.subr.bf16.mxu1 %v1113_v16  ;;  %1178 = vmatprep.subr.bf16.mxu0 %v1177_v17  ;;  %v375_v16 = vld [vmem:[#allocation5 + $0x70] sm:$0xff]  ;;  %v392_v22 = vld [vmem:[#allocation5 + $0xf8] sm:$0xff]  ;;  %v389_v27 = vld [vmem:[#allocation5 + $0xe0] sm:$0xff]  ;;  %v1201_v32 = vpack.c.bf16 %v390_v20, %v382_v18 }
  0x8b   : > { %v391_v30 = vld [vmem:[#allocation5 + $0xf0] sm:$0xff]  ;;  %v398_v31 = vld [vmem:[#allocation5 + $0x128] sm:$0xff]  ;;  %v1265_v33 = vpack.c.bf16 %v392_v22, %v384_v21  ;;  %v400_v35 = vld [vmem:[#allocation5 + $0x138] sm:$0xff] }
  0x8c   : > { %v406_v34 = vld [vmem:[#allocation5 + $0x168] sm:$0xff]  ;;  %v397_v39 = vld [vmem:[#allocation5 + $0x120] sm:$0xff]  ;;  %v399_v43 = vld [vmem:[#allocation5 + $0x130] sm:$0xff] }
  0x8d   : > { %1116 = vmatpush1.bf16.msra.mxu1 %v1115_v24  ;;  %1180 = vmatpush1.bf16.msra.mxu0 %v1179_v25  ;;  %v1199_v24 = vpack.c.bf16 %v373_v14, %v365_v12  ;;  %v1263_v25 = vpack.c.bf16 %v375_v16, %v367_v15  ;;  %v407_v44 = vld [vmem:[#allocation5 + $0x170] sm:$0xff]  ;;  %v414_v45 = vld [vmem:[#allocation5 + $0x1a8] sm:$0xff]  ;;  %v416_v47 = vld [vmem:[#allocation5 + $0x1b8] sm:$0xff] }
  0x8e   : > { %1118 = vmatprep.subr.bf16.mxu1 %v1117_v28  ;;  %1182 = vmatprep.subr.bf16.mxu0 %v1181_v29  ;;  %v383_v29 = vld [vmem:[#allocation5 + $0xb0] sm:$0xff]  ;;  %v422_v46 = vld [vmem:[#allocation5 + $0x1e8] sm:$0xff]  ;;  %v1271_v50 = vpack.c.bf16 %v407_v44, %v399_v43  ;;  %v437_v0 = vld [vmem:[#allocation5 + $0x260] sm:$0xff] }
  0x8f   : > { %v1267_v38 = vpack.c.bf16 %v391_v30, %v383_v29  ;;  %v1209_v53 = vpack.c.bf16 %v422_v46, %v414_v45  ;;  %v415_v55 = vld [vmem:[#allocation5 + $0x1b0] sm:$0xff]  ;;  %v430_v57 = vld [vmem:[#allocation5 + $0x228] sm:$0xff]  ;;  %v448_v7 = vld [vmem:[#allocation5 + $0x2b8] sm:$0xff] }
  0x90   : > { %v423_v56 = vld [vmem:[#allocation5 + $0x1f0] sm:$0xff]  ;;  %v454_v6 = vld [vmem:[#allocation5 + $0x2e8] sm:$0xff]  ;;  %v456_v8 = vld [vmem:[#allocation5 + $0x2f8] sm:$0xff] }
  0x91   : > { %1120 = vmatpush1.bf16.msra.mxu1 %v1119_v36  ;;  %1184 = vmatpush1.bf16.msra.mxu0 %v1183_v37  ;;  %v408_v36 = vld [vmem:[#allocation5 + $0x178] sm:$0xff]  ;;  %v1203_v37 = vpack.c.bf16 %v389_v27, %v381_v26  ;;  %v1275_v62 = vpack.c.bf16 %v423_v56, %v415_v55  ;;  %v439_v4 = vld [vmem:[#allocation5 + $0x270] sm:$0xff]  ;;  %v453_v12 = vld [vmem:[#allocation5 + $0x2e0] sm:$0xff]  ;;  %v1281_v14 = vpack.c.bf16 %v456_v8, %v448_v7 }
  0x92   : > { %1122 = vmatprep.subr.bf16.mxu1 %v1121_v40  ;;  %1186 = vmatprep.subr.bf16.mxu0 %v1185_v41  ;;  %v405_v40 = vld [vmem:[#allocation5 + $0x160] sm:$0xff]  ;;  %v1205_v41 = vpack.c.bf16 %v406_v34, %v398_v31  ;;  %v1269_v42 = vpack.c.bf16 %v408_v36, %v400_v35  ;;  %v447_v15 = vld [vmem:[#allocation5 + $0x2b0] sm:$0xff]  ;;  %v470_v18 = vld [vmem:[#allocation5 + $0x368] sm:$0xff] }
  0x93   : > { %v455_v16 = vld [vmem:[#allocation5 + $0x2f0] sm:$0xff]  ;;  %v472_v20 = vld [vmem:[#allocation5 + $0x378] sm:$0xff]  ;;  %v478_v30 = vld [vmem:[#allocation5 + $0x3a8] sm:$0xff] }
  0x94   : > { %v1283_v22 = vpack.c.bf16 %v455_v16, %v447_v15  ;;  %v463_v27 = vld [vmem:[#allocation5 + $0x330] sm:$0xff]  ;;  %v486_v31 = vld [vmem:[#allocation5 + $0x3e8] sm:$0xff]  ;;  %v477_v36 = vld [vmem:[#allocation5 + $0x3a0] sm:$0xff] }
  0x95   : > { %1124 = vmatpush1.bf16.msra.mxu1 %v1123_v48  ;;  %1188 = vmatpush1.bf16.msra.mxu0 %v1187_v49  ;;  %v424_v48 = vld [vmem:[#allocation5 + $0x1f8] sm:$0xff]  ;;  %v1207_v49 = vpack.c.bf16 %v405_v40, %v397_v39  ;;  %v471_v29 = vld [vmem:[#allocation5 + $0x370] sm:$0xff]  ;;  %v502_v43 = vld [vmem:[#allocation5 + $0x468] sm:$0xff] }
  0x96   : > { %1126 = vmatprep.subr.bf16.mxu1 %v1125_v51  ;;  %1190 = vmatprep.subr.bf16.mxu0 %v1189_v52  ;;  %v413_v51 = vld [vmem:[#allocation5 + $0x1a0] sm:$0xff]  ;;  %v1273_v54 = vpack.c.bf16 %v424_v48, %v416_v47  ;;  %v1287_v35 = vpack.c.bf16 %v471_v29, %v463_v27  ;;  %v479_v40 = vld [vmem:[#allocation5 + $0x3b0] sm:$0xff]  ;;  %v496_v44 = vld [vmem:[#allocation5 + $0x438] sm:$0xff] }
  0x97   : > { %v421_v52 = vld [vmem:[#allocation5 + $0x1e0] sm:$0xff]  ;;  %v504_v45 = vld [vmem:[#allocation5 + $0x478] sm:$0xff]  ;;  %v518_v55 = vld [vmem:[#allocation5 + $0x4e8] sm:$0xff] }
  0x98   : > { %v1211_v61 = vpack.c.bf16 %v421_v52, %v413_v51  ;;  %v493_v48 = vld [vmem:[#allocation5 + $0x420] sm:$0xff]  ;;  %v1293_v51 = vpack.c.bf16 %v504_v45, %v496_v44  ;;  %v495_v52 = vld [vmem:[#allocation5 + $0x430] sm:$0xff]  ;;  %v512_v56 = vld [vmem:[#allocation5 + $0x4b8] sm:$0xff] }
  0x99   : > { %1128 = vmatpush1.bf16.msra.mxu1 %v1127_v58  ;;  %1192 = vmatpush1.bf16.msra.mxu0 %v1191_v59  ;;  %v438_v58 = vld [vmem:[#allocation5 + $0x268] sm:$0xff]  ;;  %v432_v59 = vld [vmem:[#allocation5 + $0x238] sm:$0xff]  ;;  %v525_v8 = vld [vmem:[#allocation5 + $0x520] sm:$0xff] }
  0x9a   : > { %1130 = vmatprep.subr.bf16.mxu1 %v1129_v60  ;;  %1194 = vmatprep.subr.bf16.mxu0 %v1193_v63  ;;  %v440_v60 = vld [vmem:[#allocation5 + $0x278] sm:$0xff]  ;;  %v429_v63 = vld [vmem:[#allocation5 + $0x220] sm:$0xff]  ;;  %v1213_v1 = vpack.c.bf16 %v438_v58, %v430_v57  ;;  %v550_v15 = vld [vmem:[#allocation5 + $0x5e8] sm:$0xff] }
  0x9b   : > { %v1277_v2 = vpack.c.bf16 %v440_v60, %v432_v59  ;;  %v520_v57 = vld [vmem:[#allocation5 + $0x4f8] sm:$0xff]  ;;  %v509_v60 = vld [vmem:[#allocation5 + $0x4a0] sm:$0xff]  ;;  %v566_v27 = vld [vmem:[#allocation5 + $0x668] sm:$0xff] }
  0x9c   : > { %v544_v16 = vld [vmem:[#allocation5 + $0x5b8] sm:$0xff]  ;;  %v573_v45 = vld [vmem:[#allocation5 + $0x6a0] sm:$0xff] }
  0x9d   : > { %1132 = vmatpush1.bf16.msra.mxu1 %v1131_v3  ;;  %1196 = vmatpush1.bf16.msra.mxu0 %v1195_v5  ;;  %v431_v3 = vld [vmem:[#allocation5 + $0x230] sm:$0xff]  ;;  %v446_v5 = vld [vmem:[#allocation5 + $0x2a8] sm:$0xff]  ;;  %v560_v29 = vld [vmem:[#allocation5 + $0x638] sm:$0xff] }
  0x9e   : > { %1198 = vmatprep.subr.bf16.mxu1 %v1197_v9  ;;  %1262 = vmatprep.subr.bf16.mxu0 %v1261_v11  ;;  %v1215_v9 = vpack.c.bf16 %v437_v0, %v429_v63  ;;  %v1279_v10 = vpack.c.bf16 %v439_v4, %v431_v3  ;;  %v445_v11 = vld [vmem:[#allocation5 + $0x2a0] sm:$0xff]  ;;  %v1297_v63 = vpack.c.bf16 %v520_v57, %v512_v56  ;;  %v511_v0 = vld [vmem:[#allocation5 + $0x4b0] sm:$0xff]  ;;  %v534_v3 = vld [vmem:[#allocation5 + $0x568] sm:$0xff] }
  0x9f   : > { %v1219_v21 = vpack.c.bf16 %v453_v12, %v445_v11  ;;  %v528_v4 = vld [vmem:[#allocation5 + $0x538] sm:$0xff]  ;;  %v527_v12 = vld [vmem:[#allocation5 + $0x530] sm:$0xff]  ;;  %v589_v57 = vld [vmem:[#allocation5 + $0x720] sm:$0xff] }
  0xdc   : > { %v284_v13 = vpop.permute.xlu0 %283 }
 0x131   : > { %v356_v17 = vpop.f32.mrb[0].mxu0 }
 0x132   : > { %v358_v19 = vpop.f32.mrb[1].mxu0  ;;  %v1748_v28 = vadd.f32 %v356_v17, %v284_v13  ;;  %v462_v17 = vld [vmem:[#allocation5 + $0x328] sm:$0xff] }
 0x133   : > { %v359_v23 = vadd.f32 %v358_v19, %v284_v13  ;;  %v1217_v13 = vpack.c.bf16 %v454_v6, %v446_v5  ;;  %v464_v19 = vld [vmem:[#allocation5 + $0x338] sm:$0xff] }
 0x134   : > { %v1285_v26 = vpack.c.bf16 %v472_v20, %v464_v19  ;;  %v536_v5 = vld [vmem:[#allocation5 + $0x578] sm:$0xff]  ;;  %v541_v20 = vld [vmem:[#allocation5 + $0x5a0] sm:$0xff] }
 0x135   : > { %681 = vmatprep.mubr.f32.mxu1 %v359_v23  ;;  %752 = vmatprep.mubr.f32.mxu0 %v359_v23  ;;  %v1301_v11 = vpack.c.bf16 %v536_v5, %v528_v4  ;;  %v605_v5 = vld [vmem:[#allocation5 + $0x7a0] sm:$0xff] }
 0x136   : > { %682 = vmatmul.mubr.f32.vlgmr.msra.gmra.mrb[0].mxu1 %v1748_v28  ;;  %753 = vmatmul.mubr.f32.vlgmr.msra.gmra.mrb[2].mxu0 %v1748_v28 }
 0x137   : > { %1200 = vmatpush1.bf16.msra.mxu1 %v1199_v24  ;;  %1264 = vmatpush1.bf16.msra.mxu0 %v1263_v25  ;;  %v469_v24 = vld [vmem:[#allocation5 + $0x360] sm:$0xff]  ;;  %v1221_v25 = vpack.c.bf16 %v470_v18, %v462_v17  ;;  %v552_v17 = vld [vmem:[#allocation5 + $0x5f8] sm:$0xff] }
 0x138   : > { %823 = vmatprep.mubr.f32.mxu1 %v359_v23  ;;  %894 = vmatprep.mubr.f32.mxu0 %v359_v23  ;;  %v461_v23 = vld [vmem:[#allocation5 + $0x320] sm:$0xff] }
 0x139   : > { %1202 = vmatprep.subr.bf16.mxu1 %v1201_v32  ;;  %1266 = vmatprep.subr.bf16.mxu0 %v1265_v33  ;;  %v480_v32 = vld [vmem:[#allocation5 + $0x3b8] sm:$0xff]  ;;  %v1223_v34 = vpack.c.bf16 %v469_v24, %v461_v23  ;;  %v1305_v23 = vpack.c.bf16 %v552_v17, %v544_v16  ;;  %v543_v24 = vld [vmem:[#allocation5 + $0x5b0] sm:$0xff] }
 0x13a   : > { %v488_v33 = vld [vmem:[#allocation5 + $0x3f8] sm:$0xff] }
 0x13b   : > { %1204 = vmatpush1.bf16.msra.mxu1 %v1203_v37  ;;  %1268 = vmatpush1.bf16.msra.mxu0 %v1267_v38  ;;  %v485_v37 = vld [vmem:[#allocation5 + $0x3e0] sm:$0xff]  ;;  %v1225_v38 = vpack.c.bf16 %v486_v31, %v478_v30  ;;  %v1289_v39 = vpack.c.bf16 %v488_v33, %v480_v32  ;;  %v568_v30 = vld [vmem:[#allocation5 + $0x678] sm:$0xff] }
 0x13c   : > { %1206 = vmatprep.subr.bf16.mxu1 %v1205_v41  ;;  %1270 = vmatprep.subr.bf16.mxu0 %v1269_v42  ;;  %v487_v41 = vld [vmem:[#allocation5 + $0x3f0] sm:$0xff]  ;;  %v494_v42 = vld [vmem:[#allocation5 + $0x428] sm:$0xff]  ;;  %v1227_v46 = vpack.c.bf16 %v485_v37, %v477_v36  ;;  %v557_v33 = vld [vmem:[#allocation5 + $0x620] sm:$0xff]  ;;  %v1309_v36 = vpack.c.bf16 %v568_v30, %v560_v29 }
 0x13d   : > { %v1291_v47 = vpack.c.bf16 %v487_v41, %v479_v40  ;;  %v559_v37 = vld [vmem:[#allocation5 + $0x630] sm:$0xff]  ;;  %v582_v40 = vld [vmem:[#allocation5 + $0x6e8] sm:$0xff]  ;;  %v576_v41 = vld [vmem:[#allocation5 + $0x6b8] sm:$0xff] }
 0x13f   : > { %1208 = vmatpush1.bf16.msra.mxu1 %v1207_v49  ;;  %1272 = vmatpush1.bf16.msra.mxu0 %v1271_v50  ;;  %v501_v49 = vld [vmem:[#allocation5 + $0x460] sm:$0xff]  ;;  %v1229_v50 = vpack.c.bf16 %v502_v43, %v494_v42  ;;  %v584_v42 = vld [vmem:[#allocation5 + $0x6f8] sm:$0xff] }
 0x140   : > { %1210 = vmatprep.subr.bf16.mxu1 %v1209_v53  ;;  %1274 = vmatprep.subr.bf16.mxu0 %v1273_v54  ;;  %v503_v53 = vld [vmem:[#allocation5 + $0x470] sm:$0xff]  ;;  %v510_v54 = vld [vmem:[#allocation5 + $0x4a8] sm:$0xff]  ;;  %v1231_v58 = vpack.c.bf16 %v501_v49, %v493_v48  ;;  %v1313_v48 = vpack.c.bf16 %v584_v42, %v576_v41 }
 0x141   : > { %v1295_v59 = vpack.c.bf16 %v503_v53, %v495_v52  ;;  %v575_v49 = vld [vmem:[#allocation5 + $0x6b0] sm:$0xff]  ;;  %v598_v52 = vld [vmem:[#allocation5 + $0x768] sm:$0xff]  ;;  %v592_v53 = vld [vmem:[#allocation5 + $0x738] sm:$0xff] }
 0x143   : > { %1212 = vmatpush1.bf16.msra.mxu1 %v1211_v61  ;;  %1276 = vmatpush1.bf16.msra.mxu0 %v1275_v62  ;;  %v517_v61 = vld [vmem:[#allocation5 + $0x4e0] sm:$0xff]  ;;  %v1233_v62 = vpack.c.bf16 %v518_v55, %v510_v54  ;;  %v600_v54 = vld [vmem:[#allocation5 + $0x778] sm:$0xff] }
 0x144   : > { %1214 = vmatprep.subr.bf16.mxu1 %v1213_v1  ;;  %1278 = vmatprep.subr.bf16.mxu0 %v1277_v2  ;;  %v519_v1 = vld [vmem:[#allocation5 + $0x4f0] sm:$0xff]  ;;  %v526_v2 = vld [vmem:[#allocation5 + $0x528] sm:$0xff]  ;;  %v1235_v6 = vpack.c.bf16 %v517_v61, %v509_v60  ;;  %v1317_v60 = vpack.c.bf16 %v600_v54, %v592_v53 }
 0x145   : > { %v1299_v7 = vpack.c.bf16 %v519_v1, %v511_v0  ;;  %v591_v61 = vld [vmem:[#allocation5 + $0x730] sm:$0xff]  ;;  %v614_v0 = vld [vmem:[#allocation5 + $0x7e8] sm:$0xff]  ;;  %v608_v1 = vld [vmem:[#allocation5 + $0x7b8] sm:$0xff] }
 0x147   : > { %1216 = vmatpush1.bf16.msra.mxu1 %v1215_v9  ;;  %1280 = vmatpush1.bf16.msra.mxu0 %v1279_v10  ;;  %v533_v9 = vld [vmem:[#allocation5 + $0x560] sm:$0xff]  ;;  %v1237_v10 = vpack.c.bf16 %v534_v3, %v526_v2  ;;  %v616_v2 = vld [vmem:[#allocation5 + $0x7f8] sm:$0xff] }
 0x148   : > { %1218 = vmatprep.subr.bf16.mxu1 %v1217_v13  ;;  %1282 = vmatprep.subr.bf16.mxu0 %v1281_v14  ;;  %v535_v13 = vld [vmem:[#allocation5 + $0x570] sm:$0xff]  ;;  %v542_v14 = vld [vmem:[#allocation5 + $0x5a8] sm:$0xff]  ;;  %v1239_v18 = vpack.c.bf16 %v533_v9, %v525_v8  ;;  %v613_v8 = vld [vmem:[#allocation5 + $0x7e0] sm:$0xff] }
 0x149   : > { %v1303_v19 = vpack.c.bf16 %v535_v13, %v527_v12  ;;  %v607_v9 = vld [vmem:[#allocation5 + $0x7b0] sm:$0xff] }
 0x14b   : > { %1220 = vmatpush1.bf16.msra.mxu1 %v1219_v21  ;;  %1284 = vmatpush1.bf16.msra.mxu0 %v1283_v22  ;;  %v549_v21 = vld [vmem:[#allocation5 + $0x5e0] sm:$0xff]  ;;  %v1241_v22 = vpack.c.bf16 %v550_v15, %v542_v14 }
 0x14c   : > { %1222 = vmatprep.subr.bf16.mxu1 %v1221_v25  ;;  %1286 = vmatprep.subr.bf16.mxu0 %v1285_v26  ;;  %v551_v25 = vld [vmem:[#allocation5 + $0x5f0] sm:$0xff]  ;;  %v558_v26 = vld [vmem:[#allocation5 + $0x628] sm:$0xff]  ;;  %v1243_v31 = vpack.c.bf16 %v549_v21, %v541_v20 }
 0x14d   : > { %v1307_v32 = vpack.c.bf16 %v551_v25, %v543_v24 }
 0x14f   : > { %1224 = vmatpush1.bf16.msra.mxu1 %v1223_v34  ;;  %1288 = vmatpush1.bf16.msra.mxu0 %v1287_v35  ;;  %v565_v34 = vld [vmem:[#allocation5 + $0x660] sm:$0xff]  ;;  %v1245_v35 = vpack.c.bf16 %v566_v27, %v558_v26 }
 0x150   : > { %1226 = vmatprep.subr.bf16.mxu1 %v1225_v38  ;;  %1290 = vmatprep.subr.bf16.mxu0 %v1289_v39  ;;  %v567_v38 = vld [vmem:[#allocation5 + $0x670] sm:$0xff]  ;;  %v574_v39 = vld [vmem:[#allocation5 + $0x6a8] sm:$0xff]  ;;  %v1247_v43 = vpack.c.bf16 %v565_v34, %v557_v33 }
 0x151   : > { %v1311_v44 = vpack.c.bf16 %v567_v38, %v559_v37 }
 0x153   : > { %1228 = vmatpush1.bf16.msra.mxu1 %v1227_v46  ;;  %1292 = vmatpush1.bf16.msra.mxu0 %v1291_v47  ;;  %v581_v46 = vld [vmem:[#allocation5 + $0x6e0] sm:$0xff]  ;;  %v1249_v47 = vpack.c.bf16 %v582_v40, %v574_v39 }
 0x154   : > { %1230 = vmatprep.subr.bf16.mxu1 %v1229_v50  ;;  %1294 = vmatprep.subr.bf16.mxu0 %v1293_v51  ;;  %v583_v50 = vld [vmem:[#allocation5 + $0x6f0] sm:$0xff]  ;;  %v590_v51 = vld [vmem:[#allocation5 + $0x728] sm:$0xff]  ;;  %v1251_v55 = vpack.c.bf16 %v581_v46, %v573_v45 }
 0x155   : > { %v1315_v56 = vpack.c.bf16 %v583_v50, %v575_v49 }
 0x157   : > { %1232 = vmatpush1.bf16.msra.mxu1 %v1231_v58  ;;  %1296 = vmatpush1.bf16.msra.mxu0 %v1295_v59  ;;  %v597_v58 = vld [vmem:[#allocation5 + $0x760] sm:$0xff]  ;;  %v1253_v59 = vpack.c.bf16 %v598_v52, %v590_v51 }
 0x158   : > { %1234 = vmatprep.subr.bf16.mxu1 %v1233_v62  ;;  %1298 = vmatprep.subr.bf16.mxu0 %v1297_v63  ;;  %v599_v62 = vld [vmem:[#allocation5 + $0x770] sm:$0xff]  ;;  %v606_v63 = vld [vmem:[#allocation5 + $0x7a8] sm:$0xff]  ;;  %v1255_v3 = vpack.c.bf16 %v597_v58, %v589_v57 }
 0x159   : > { %v1319_v4 = vpack.c.bf16 %v599_v62, %v591_v61 }
 0x15b   : > { %1236 = vmatpush1.bf16.msra.mxu1 %v1235_v6  ;;  %1300 = vmatpush1.bf16.msra.mxu0 %v1299_v7  ;;  %v1257_v6 = vpack.c.bf16 %v614_v0, %v606_v63  ;;  %v1321_v7 = vpack.c.bf16 %v616_v2, %v608_v1 }
 0x15c   : > { %1238 = vmatprep.subr.bf16.mxu1 %v1237_v10  ;;  %1302 = vmatprep.subr.bf16.mxu0 %v1301_v11  ;;  %v615_v10 = vld [vmem:[#allocation5 + $0x7f0] sm:$0xff]  ;;  %v1259_v11 = vpack.c.bf16 %v613_v8, %v605_v5 }
 0x15d   : > { %v1323_v12 = vpack.c.bf16 %v615_v10, %v607_v9 }
 0x15f   : > { %1240 = vmatpush1.bf16.msra.mxu1 %v1239_v18  ;;  %1304 = vmatpush1.bf16.msra.mxu0 %v1303_v19 }
 0x160   : > { %1242 = vmatprep.subr.bf16.mxu1 %v1241_v22  ;;  %1306 = vmatprep.subr.bf16.mxu0 %v1305_v23 }
 0x163   : > { %1244 = vmatpush1.bf16.msra.mxu1 %v1243_v31  ;;  %1308 = vmatpush1.bf16.msra.mxu0 %v1307_v32 }
 0x164   : > { %1246 = vmatprep.subr.bf16.mxu1 %v1245_v35  ;;  %1310 = vmatprep.subr.bf16.mxu0 %v1309_v36 }
 0x167   : > { %1248 = vmatpush1.bf16.msra.mxu1 %v1247_v43  ;;  %1312 = vmatpush1.bf16.msra.mxu0 %v1311_v44 }
 0x168   : > { %1250 = vmatprep.subr.bf16.mxu1 %v1249_v47  ;;  %1314 = vmatprep.subr.bf16.mxu0 %v1313_v48 }
 0x16b   : > { %1252 = vmatpush1.bf16.msra.mxu1 %v1251_v55  ;;  %1316 = vmatpush1.bf16.msra.mxu0 %v1315_v56 }
 0x16c   : > { %1254 = vmatprep.subr.bf16.mxu1 %v1253_v59  ;;  %1318 = vmatprep.subr.bf16.mxu0 %v1317_v60 }
 0x16f   : > { %1256 = vmatpush1.bf16.msra.mxu1 %v1255_v3  ;;  %1320 = vmatpush1.bf16.msra.mxu0 %v1319_v4 }
 0x170   : > { %1258 = vmatprep.subr.bf16.mxu1 %v1257_v6  ;;  %1322 = vmatprep.subr.bf16.mxu0 %v1321_v7 }
 0x173   : > { %1260 = vmatpush1.bf16.msra.mxu1 %v1259_v11  ;;  %1324 = vmatpush1.bf16.msra.mxu0 %v1323_v12 }
 0x176   : > { %824 = vmatmul.mubr.f32.vlgmr.msra.gmra.mrb[2].mxu1 %v1748_v28  ;;  %895 = vmatmul.mubr.f32.vlgmr.msra.gmra.mrb[4].mxu0 %v1748_v28 }
 0x209   : > { %v683_v13 = vpop.f32.mrb[0].mxu1  ;;  %v754_v14 = vpop.f32.mrb[2].mxu0 }
 0x20a   : > { %901 = vst [vmem:[%s268_s22] sm:$0xff] %v683_v13  ;;  %903 = vst [vmem:[%s268_s22 + $0x10] sm:$0xff] %v754_v14  ;;  %v685_v15 = vpop.f32.mrb[1].mxu1  ;;  %v756_v16 = vpop.f32.mrb[3].mxu0 }
 0x20b   : > { %902 = vst [vmem:[%s268_s22 + $0x8] sm:$0xff] %v685_v15  ;;  %904 = vst [vmem:[%s268_s22 + $0x18] sm:$0xff] %v756_v16 }
 0x249   : > { %v825_v17 = vpop.f32.mrb[2].mxu1  ;;  %v896_v18 = vpop.f32.mrb[4].mxu0 }
 0x24a   : > { %905 = vst [vmem:[%s268_s22 + $0x20] sm:$0xff] %v825_v17  ;;  %907 = vst [vmem:[%s268_s22 + $0x30] sm:$0xff] %v896_v18  ;;  %v827_v28 = vpop.f32.mrb[3].mxu1  ;;  %v898_v19 = vpop.f32.mrb[5].mxu0 }
 0x24b   : > { %906 = vst [vmem:[%s268_s22 + $0x28] sm:$0xff] %v827_v28  ;;  %908 = vst [vmem:[%s268_s22 + $0x38] sm:$0xff] %v898_v19 }
 0x24c   : > { %1474 = shalt.err (!%p1471_p5)
}
 0x24d   : > { %s1475_s6 = scalar_lea.hbm %s1759_s24, 1024  ;;  %s1479_s25 = scalar_lea.hbm %s1812_s4, 2048 }
 0x24e   : > { %p1476_p9 = scmp.ne.s32.totalorder %s1759_s24, %s1475_s6  ;;  %p1480_p7 = scmp.lt.u32.totalorder %s1759_s24, %s1812_s4 }
 0x24f   : > { %p1481_p3 = scmp.lt.u32.totalorder %s1479_s25, %s1475_s6  ;;  %p1483_p13 = scmp.lt.u32.totalorder %s1475_s6, %s1759_s24 }
 0x250   : > { %p1477_p1 = pnand %p1476_p9, %p1677_p10 }
 0x251   : > { %p1482_p4 = por %p1481_p3, %p1480_p7 }
 0x252   : > { %p1478_p2 = pneg %p1477_p1 }
 0x253   : > { %p1484_p6 = por %p1483_p13, %p1482_p4 }
 0x255   : > { %p1485_p8 = pnand %p1484_p6, %p1478_p2 }
 0x257   : > { %1488 = shalt.err (!%p1485_p8)
}
 0x258   : > { %1331 = dma.vmem_to_hbm [thread:$0]  (%p1677_p10), %s1761_s12, 1024, %s1759_s24, %s910_s18  }
 0x259 PF: > { %s938_s22 = sand.u32 1, %s1527_s15   ;;  %p1830_p12 = scmp.ne.s32.totalorder %s1820_s26, 0 }
 0x25a   : > { %p1831_p11 = scmp.ge.s32.totalorder %s1547_s20, 2  ;;  %s939_s28 = scalar_lea.sflag [#allocation4], %s938_s22 }
 0x25c   : > { %p1342_p0 = pnand %p1831_p11, %p1830_p12 }
 0x25e   : > { %1522 = dma.done.wait (!%p1342_p0), %s939_s28, 1024  }
 0x25f   : > { %1524 = vsyncadd (!%p1342_p0), %s939_s28, 4294966272  ;;  %s21_s20 = sadd.s32 1, %s1547_s20   ;;  %s1832_s15 = smov %s1531_s16 }
 0x260   : > { %p18_p5 = scmp.ge.s32.totalorder %s21_s20, 4   ;;  %s1833_s16 = smov %s1535_s17 }
 0x261   : > { %s1834_s17 = smov %s1686_s10  ;;  %s1835_s18 = smov %s1543_s19 }
 0x262   : > { %s1836_s19 = smov %s1838_s5  ;;  %20 = sbr.rel (!%p18_p5) target bundleno = 7 (0x7), region = 91 }
 0x269   :  { %944 = vsyncpa [#allocation3], 1 }
 0x26a   :  { %946 = vsyncpa [#allocation3 + $0x1], 1 }
 0x26b   :  { %947 = vsyncpa [#allocation6], 1 }
 0x26c   :  { %948 = vsyncpa [#allocation4], 1 }
 0x26d   :  { %950 = vsyncpa [#allocation4 + $0x1], 1 }

</bundles_post_ra>
